<compile_context>
chip_gen: v5e
topology: v5e:2x2
jax: 0.10.0
libtpu: 0.0.40
codegen_flags: <defaults>
</compile_context>

<pallas_src>
import math

import jax
import jax.numpy as jnp
import numpy as np
from jax.experimental import pallas as pl
from jax.experimental.pallas import tpu as pltpu


def _round_up(x: int, m: int) -> int:
    return ((x + m - 1) // m) * m


def _cdiv(a: int, b: int) -> int:
    return -(-a // b)


def _vmem_capacity_bytes() -> int:
    """Generation-aware VMEM capacity (falls back to v7x's 64 MiB per core)."""
    try:
        return int(pltpu.get_tpu_info().vmem_capacity_bytes)
    except Exception:
        return 64 << 20


def _make_fast_kernel(batch: int, size: int, offset: int, tf: int,
                      win_chunks: int, out_dtype):
    """Fast path: offset % 128 == 0 and size % 128 == 0.

    The signal lives in HBM as [B, n_chunks, 128]; each grid step DMAs the
    win_chunks = (tf-1)*offset/128 + size/128 chunks it needs into VMEM scratch,
    accumulates per-frame DC sums chunk-by-chunk (f32), then writes each
    windowed, mean-removed 128-lane chunk of the (B, tf, size) output block.
    """
    cs = size // 128      # lane-chunks per frame
    co = offset // 128    # lane-chunks per hop
    inv_size = np.float32(1.0 / size)

    def chunk_rows(buf, k):
        # Rows of chunk k for all tf frames of this tile: buf chunks k + j*co.
        if co == 1:
            return buf[:, pl.ds(k, tf), :]                    # [B, tf, 128]
        # TODO(synk): strided sublane read only hit for offset >= 256 configs.
        return buf[:, pl.ds(k, tf, stride=co), :]             # [B, tf, 128]

    def kernel(x_hbm, w_ref, o_ref, buf, sem):
        t = pl.program_id(0)
        c0 = t * (tf * co)                                    # first chunk of tile
        cp = pltpu.make_async_copy(
            x_hbm.at[:, pl.ds(c0, win_chunks), :], buf, sem.at[0])
        cp.start()
        cp.wait()

        w = w_ref[...]                                        # [1, size] float32

        # Pass 1: per-frame DC sum = sum of per-chunk lane reductions (f32).
        total = jnp.zeros((batch, tf, 1), jnp.float32)
        for k in range(cs):
            rows = chunk_rows(buf, k).astype(jnp.float32)
            total = total + jnp.sum(rows, axis=-1, keepdims=True)
        mean = total * inv_size                               # [B, tf, 1]

        # Pass 2: per-chunk subtract / window / store (full 128-lane stores).
        for k in range(cs):
            rows = chunk_rows(buf, k).astype(jnp.float32)
            wk = w[:, k * 128:(k + 1) * 128]                  # [1, 128]
            o_ref[:, :, k * 128:(k + 1) * 128] = (
                (rows - mean) * wk).astype(out_dtype)

    return kernel


def _make_generic_kernel(size: int, offset: int, tf: int, out_dtype):
    """Fallback for non-128-aligned offset/size: per-frame dynamic lane slices,
    per-frame mean and direct per-frame stores (no jnp.stack)."""
    inv_size = np.float32(1.0 / size)

    def kernel(x_ref, w_ref, o_ref):
        f0 = pl.program_id(0) * tf
        w = w_ref[...]                                        # [1, size] float32
        for j in range(tf):
            start = (f0 + j) * offset
            frame = x_ref[:, pl.ds(start, size)].astype(jnp.float32)   # [B, size]
            mean = jnp.sum(frame, axis=-1, keepdims=True) * inv_size
            out = ((frame - mean) * w).astype(out_dtype)               # [B, size]
            o_ref[:, j:j + 1, :] = out[:, None, :]

    return kernel


def lpc_slicer(x, *, sr: int = 16000, duration: float = 0.016,
               overlap: float = 0.5, padded: bool = False,
               frames_per_step: int = 512):
    """Pallas implementation of LPCSlicer.forward.

    x: [B, S] float signal. Returns [B, F, size] windowed, DC-removed frames.
    """
    size = int(math.floor(duration * sr))          # 256 for defaults
    offset = int(math.floor(size * overlap))       # 128 for defaults
    padding = offset if padded else 0
    out_dtype = x.dtype

    # torch.hann_window(size) (periodic): 0.5 * (1 - cos(2*pi*n/size)); keep f32.
    n = jnp.arange(size, dtype=jnp.float32)
    window = (0.5 * (1.0 - jnp.cos(2.0 * jnp.pi * n / size))).reshape(1, size)

    if padding:
        x = jnp.pad(x, ((0, 0), (0, padding)))

    B, S = x.shape
    F = (S - size) // offset + 1
    assert F >= 1, "signal too short for one frame"

    itemsize = jnp.dtype(x.dtype).itemsize
    cap = _vmem_capacity_bytes()
    budget = max(min(cap - (8 << 20), 100 << 20), 12 << 20)

    fast = (offset % 128 == 0) and (size % 128 == 0) and offset > 0

    if fast:
        cs, co = size // 128, offset // 128

        # Frame-tile size: big enough to amortize per-step overhead, but keep
        # >= ~4 grid tiles so v7x's two TensorCores both get work.
        TF = _round_up(max(8, min(frames_per_step, F)), 8)
        if F >= 32:
            TF = min(TF, max(8, (F // 4) // 8 * 8))

        def vmem_bytes(tf):
            wc = (tf - 1) * co + cs
            return ((2 * B * tf * size            # double-buffered output block
                     + B * wc * 128)              # input window scratch (single)
                    * itemsize + 2 * size * 4 + (2 << 20))

        while TF > 8 and vmem_bytes(TF) > budget:
            TF = max(8, (TF // 2) // 8 * 8)

        n_tiles = _cdiv(F, TF)
        win_chunks = (TF - 1) * co + cs
        n_chunks_pad = (n_tiles * TF - 1) * co + cs
        S_pad = n_chunks_pad * 128
        if S < S_pad:                              # zero-pad input only (never the output)
            x = jnp.pad(x, ((0, 0), (0, S_pad - S)))
        elif S > S_pad:
            x = x[:, :S_pad]
        x3d = x.reshape(B, n_chunks_pad, 128)

        est = vmem_bytes(TF)
        vmem_limit = int(min(est, budget)) if est > (14 << 20) else None

        out = pl.pallas_call(
            _make_fast_kernel(B, size, offset, TF, win_chunks, out_dtype),
            out_shape=jax.ShapeDtypeStruct((B, F, size), out_dtype),
            grid=(n_tiles,),
            in_specs=[
                pl.BlockSpec(memory_space=pl.ANY),            # signal stays in HBM
                pl.BlockSpec((1, size), lambda t: (0, 0)),    # hann window
            ],
            out_specs=pl.BlockSpec((B, TF, size), lambda t: (0, t, 0)),
            scratch_shapes=[
                pltpu.VMEM((B, win_chunks, 128), x.dtype),
                pltpu.SemaphoreType.DMA((1,)),
            ],
            compiler_params=pltpu.CompilerParams(
                dimension_semantics=("parallel",),
                vmem_limit_bytes=vmem_limit),
        )(x3d, window)
    else:
        # TODO(synk): non-128-aligned offset/size keep the signal resident and
        # use per-frame dynamic lane slices; only hit for non-default params.
        TF = 8
        n_tiles = _cdiv(F, TF)
        S_pad = (n_tiles * TF - 1) * offset + size
        if S < S_pad:
            x = jnp.pad(x, ((0, 0), (0, S_pad - S)))
        elif S > S_pad:
            x = x[:, :S_pad]

        est = (2 * B * S_pad + 2 * B * TF * size) * itemsize + 2 * size * 4 + (2 << 20)
        vmem_limit = int(min(est, budget)) if est > (14 << 20) else None

        out = pl.pallas_call(
            _make_generic_kernel(size, offset, TF, out_dtype),
            out_shape=jax.ShapeDtypeStruct((B, F, size), out_dtype),
            grid=(n_tiles,),
            in_specs=[
                pl.BlockSpec((B, S_pad), lambda t: (0, 0)),
                pl.BlockSpec((1, size), lambda t: (0, 0)),
            ],
            out_specs=pl.BlockSpec((B, TF, size), lambda t: (0, t, 0)),
            compiler_params=pltpu.CompilerParams(
                dimension_semantics=("parallel",),
                vmem_limit_bytes=vmem_limit),
        )(x, window)

    return out


def _reference(x, *, sr=16000, duration=0.016, overlap=0.5, padded=False):
    """Pure-JAX reference mirroring the PyTorch module."""
    size = int(math.floor(duration * sr))
    offset = int(math.floor(size * overlap))
    padding = offset if padded else 0
    n = jnp.arange(size, dtype=jnp.float32)
    window = 0.5 * (1.0 - jnp.cos(2.0 * jnp.pi * n / size))
    if padding:
        x = jnp.pad(x, ((0, 0), (0, padding)))
    S = x.shape[-1]
    F = (S - size) // offset + 1
    idx = offset * jnp.arange(F)[:, None] + jnp.arange(size)[None, :]
    frames = x[:, idx].astype(jnp.float32)               # [B, F, size]
    frames = frames - frames.mean(axis=-1, keepdims=True)
    return (frames * window).astype(x.dtype)


if __name__ == "__main__":
    key = jax.random.PRNGKey(0)
    B = 2
    size, offset = 256, 128
    n_frames = 41                                         # not a multiple of TF -> ragged last block
    S = size + (n_frames - 1) * offset                    # 5376 samples
    x = jax.random.normal(key, (B, S), dtype=jnp.float32)

    out = lpc_slicer(x)
    out = jax.block_until_ready(out)

    ref = _reference(x)
    assert out.shape == (B, n_frames, size), out.shape
    np.testing.assert_allclose(np.asarray(out), np.asarray(ref),
                               rtol=1e-5, atol=1e-5)
    print("KERNEL_OK")
</pallas_src>

<mosaic_0001>
module attributes {stable_mosaic.version = 11 : i64} {
  func.func @kernel(%arg0: i32, %arg1: memref<2x49x128xf32, #tpu.memory_space<any>>, %arg2: memref<1x256xf32, #tpu.memory_space<vmem>>, %arg3: memref<2x8x256xf32, #tpu.memory_space<vmem>>, %arg4: memref<2x9x128xf32, #tpu.memory_space<vmem>>, %arg5: memref<1x!tpu.dma_semaphore, #tpu.memory_space<semaphore_mem>>) attributes {dimension_semantics = [#tpu.dimension_semantics<parallel>], iteration_bounds = array<i64: 6>, scalar_prefetch = 0 : i64, scratch_operands = 2 : i64, tpu.core_type = #tpu.core_type<tc>, window_params = [{}, {pipeline_mode = #tpu.pipeline_mode<synchronous>, transform_indices = @transform_1, window_bounds = array<i64: 1, 256>}, {transform_indices = @transform_2, window_bounds = array<i64: 2, 8, 256>}]} {
    %c8_i32 = arith.constant 8 : i32
    %0 = arith.muli %arg0, %c8_i32 : i32
    %c0_i32 = arith.constant 0 : i32
    %c0_i32_0 = arith.constant 0 : i32
    %c0_i32_1 = arith.constant 0 : i32
    %1 = tpu.memref_slice %arg1[%c0_i32_0, %0, %c0_i32_1] : memref<2x49x128xf32, #tpu.memory_space<any>> -> memref<2x9x128xf32, #tpu.memory_space<any>>
    %2 = tpu.memref_slice %arg5[%c0_i32] : memref<1x!tpu.dma_semaphore, #tpu.memory_space<semaphore_mem>> -> memref<1x!tpu.dma_semaphore, #tpu.memory_space<semaphore_mem>>
    %3 = tpu.memref_squeeze %2 : memref<1x!tpu.dma_semaphore, #tpu.memory_space<semaphore_mem>> -> memref<!tpu.dma_semaphore, #tpu.memory_space<semaphore_mem>>
    tpu.enqueue_dma source(%1 : memref<2x9x128xf32, #tpu.memory_space<any>>) target(%arg4 : memref<2x9x128xf32, #tpu.memory_space<vmem>>) target_semaphore(%3 : memref<!tpu.dma_semaphore, #tpu.memory_space<semaphore_mem>>)
    %c0_i32_2 = arith.constant 0 : i32
    %c0_i32_3 = arith.constant 0 : i32
    %c0_i32_4 = arith.constant 0 : i32
    %4 = tpu.memref_slice %arg1[%c0_i32_3, %0, %c0_i32_4] : memref<2x49x128xf32, #tpu.memory_space<any>> -> memref<2x9x128xf32, #tpu.memory_space<any>>
    %5 = tpu.memref_slice %arg5[%c0_i32_2] : memref<1x!tpu.dma_semaphore, #tpu.memory_space<semaphore_mem>> -> memref<1x!tpu.dma_semaphore, #tpu.memory_space<semaphore_mem>>
    %6 = tpu.memref_squeeze %5 : memref<1x!tpu.dma_semaphore, #tpu.memory_space<semaphore_mem>> -> memref<!tpu.dma_semaphore, #tpu.memory_space<semaphore_mem>>
    tpu.wait_dma2 semaphore(%6 : memref<!tpu.dma_semaphore, #tpu.memory_space<semaphore_mem>>) src(%4 : memref<2x9x128xf32, #tpu.memory_space<any>>) dst(%arg4 : memref<2x9x128xf32, #tpu.memory_space<vmem>>)
    %c0 = arith.constant 0 : index
    %c0_5 = arith.constant 0 : index
    %7 = vector.load %arg2[%c0, %c0_5] : memref<1x256xf32, #tpu.memory_space<vmem>>, vector<1x256xf32>
    %cst = arith.constant 0.000000e+00 : f32
    %8 = vector.broadcast %cst : f32 to vector<2x8x1xf32>
    %c0_6 = arith.constant 0 : index
    %c0_7 = arith.constant 0 : index
    %c0_8 = arith.constant 0 : index
    %9 = vector.load %arg4[%c0_6, %c0_7, %c0_8] : memref<2x9x128xf32, #tpu.memory_space<vmem>>, vector<2x8x128xf32>
    %cst_9 = arith.constant dense<0.000000e+00> : vector<2x8xf32>
    %10 = vector.multi_reduction <add>, %9, %cst_9 [2] : vector<2x8x128xf32> to vector<2x8xf32>
    %11 = vector.shape_cast %10 : vector<2x8xf32> to vector<2x8x1xf32>
    %12 = arith.addf %8, %11 : vector<2x8x1xf32>
    %c0_10 = arith.constant 0 : index
    %c1 = arith.constant 1 : index
    %c0_11 = arith.constant 0 : index
    %13 = vector.load %arg4[%c0_10, %c1, %c0_11] : memref<2x9x128xf32, #tpu.memory_space<vmem>>, vector<2x8x128xf32>
    %cst_12 = arith.constant dense<0.000000e+00> : vector<2x8xf32>
    %14 = vector.multi_reduction <add>, %13, %cst_12 [2] : vector<2x8x128xf32> to vector<2x8xf32>
    %15 = vector.shape_cast %14 : vector<2x8xf32> to vector<2x8x1xf32>
    %16 = arith.addf %12, %15 : vector<2x8x1xf32>
    %cst_13 = arith.constant 3.906250e-03 : f32
    %17 = vector.broadcast %cst_13 : f32 to vector<2x8x1xf32>
    %18 = arith.mulf %16, %17 : vector<2x8x1xf32>
    %c0_14 = arith.constant 0 : index
    %c0_15 = arith.constant 0 : index
    %c0_16 = arith.constant 0 : index
    %19 = vector.load %arg4[%c0_14, %c0_15, %c0_16] : memref<2x9x128xf32, #tpu.memory_space<vmem>>, vector<2x8x128xf32>
    %20 = vector.extract_strided_slice %7 {offsets = [0, 0], sizes = [1, 128], strides = [1, 1]} : vector<1x256xf32> to vector<1x128xf32>
    %21 = vector.broadcast %18 : vector<2x8x1xf32> to vector<2x8x128xf32>
    %22 = arith.subf %19, %21 : vector<2x8x128xf32>
    %23 = vector.shape_cast %20 : vector<1x128xf32> to vector<1x1x128xf32>
    %24 = vector.broadcast %23 : vector<1x1x128xf32> to vector<2x8x128xf32>
    %25 = arith.mulf %22, %24 : vector<2x8x128xf32>
    %c0_17 = arith.constant 0 : index
    %c0_18 = arith.constant 0 : index
    %c0_19 = arith.constant 0 : index
    %26 = vector.load %arg3[%c0_17, %c0_18, %c0_19] : memref<2x8x256xf32, #tpu.memory_space<vmem>>, vector<2x8x128xf32>
    tpu.vector_store %arg3[%c0_17, %c0_18, %c0_19], %25 {strides = array<i32>} : memref<2x8x256xf32, #tpu.memory_space<vmem>>, vector<2x8x128xf32>,
    %c0_20 = arith.constant 0 : index
    %c1_21 = arith.constant 1 : index
    %c0_22 = arith.constant 0 : index
    %27 = vector.load %arg4[%c0_20, %c1_21, %c0_22] : memref<2x9x128xf32, #tpu.memory_space<vmem>>, vector<2x8x128xf32>
    %28 = vector.extract_strided_slice %7 {offsets = [0, 128], sizes = [1, 128], strides = [1, 1]} : vector<1x256xf32> to vector<1x128xf32>
    %29 = vector.broadcast %18 : vector<2x8x1xf32> to vector<2x8x128xf32>
    %30 = arith.subf %27, %29 : vector<2x8x128xf32>
    %31 = vector.shape_cast %28 : vector<1x128xf32> to vector<1x1x128xf32>
    %32 = vector.broadcast %31 : vector<1x1x128xf32> to vector<2x8x128xf32>
    %33 = arith.mulf %30, %32 : vector<2x8x128xf32>
    %c0_23 = arith.constant 0 : index
    %c0_24 = arith.constant 0 : index
    %c128 = arith.constant 128 : index
    %34 = vector.load %arg3[%c0_23, %c0_24, %c128] : memref<2x8x256xf32, #tpu.memory_space<vmem>>, vector<2x8x128xf32>
    tpu.vector_store %arg3[%c0_23, %c0_24, %c128], %33 {strides = array<i32>} : memref<2x8x256xf32, #tpu.memory_space<vmem>>, vector<2x8x128xf32>,
    return
  }
  func.func @transform_1(%arg0: i32) -> (i32, i32) {
    %c0_i32 = arith.constant 0 : i32
    %c0_i32_0 = arith.constant 0 : i32
    %c0_i32_1 = arith.constant 0 : i32
    return %c0_i32, %c0_i32_0 : i32, i32
  }
  func.func @transform_2(%arg0: i32) -> (i32, i32, i32) {
    %c0_i32 = arith.constant 0 : i32
    %c0_i32_0 = arith.constant 0 : i32
    %c0_i32_1 = arith.constant 0 : i32
    return %c0_i32, %arg0, %c0_i32_0 : i32, i32, i32
  }
}

</mosaic_0001>

<bundles_post_ra>
// kernel: tpu_custom_call.1
= control target key start
LH: loop header
LB: loop body
LE: loop exit
PB: predicated region body
PF: predicated region fallthrough
CT: control target
= control target key end

     0   :  { %s338_s9 = smov 0   ;;  %s340_s10 = smov 0   ;;  %s397_s0 = inlined_call_operand.vmem [shape: f32[2,49,128], index: 0, kind: input, shape index: {}]   ;;  %s398_s1 = inlined_call_operand.vmem [shape: f32[1,256], index: 1, kind: input, shape index: {}]   ;;  %s399_s2 = inlined_call_operand.vmem [shape: f32[2,41,256], index: 2, kind: output, shape index: {}]  }
   0x1   :  { %s342_s11 = smov 0  }
   0x2 LB: > { %s349_s12 = sadd.s32 4294967295, %s321_s11   ;;  %s351_s13 = sadd.s32 1, %s321_s11   ;;  %s321_s11 = sphi %s342_s11, %s403_s11   ;;  %s317_s10 = sphi %s340_s10, %s402_s10   ;;  %s313_s9 = sphi %s338_s9, %s401_s9  }
   0x3   : > { %s37_s14 = ssub.s32 %s321_s11, %s351_s13  ;;  %s40_s15 = sadd.s32 1, %s317_s10 }
   0x4   : > { %p38_p0 = scmp.eq.s32.totalorder %s37_s14, 0  ;;  %p50_p1 = scmp.ne.s32.totalorder %s317_s10, %s313_s9 }
   0x5   : > { %p51_p2 = scmp.eq.s32.totalorder %s349_s12, 5  ;;  %p261_p3 = scmp.ge.s32.totalorder %s321_s11, 1 }
   0x6   : > { %s358_s16 = scalar_select %p38_p0, %s317_s10, %s40_s15  }
   0x7   : > { %p360_p4 = por %p51_p2, %p50_p1  ;;  %p78_p5 = scmp.lt.s32.totalorder %s321_s11, 7 }
   0x9   : > { %p79_p6 = pnand %p261_p3, %p78_p5 }
   0xa   : > { %s89_s18 = sand.u32 (!%p79_p6), 1, %s313_s9   ;;  %s263_s19 = sshll.u32 (!%p79_p6), %s349_s12, 3 }
   0xb   : > { %82 = sbr.rel (%p79_p6) target bundleno = 169 (0xa9), region = 24  ;;  %s262_s20 = sshll.u32 (!%p79_p6), %s89_s18, 5 }
   0xc   : > { %s93_s23 = scalar_lea.vmem (!%p79_p6), %s397_s0, %s263_s19  ;;  %s368_s24 = scalar_lea.vmem (!%p79_p6), [#allocation4], %s262_s20 }
  0x10   : > { %v106_v0 = vld [vmem:[%s93_s23] sm:$0xff]  ;;  %v108_v1 = vld [vmem:[%s93_s23 + $0x38] sm:$0xff]  ;;  %v264_v2 = vld [vmem:[%s93_s23 + $0x8] sm:$0x1] }
  0x11   : > { %107 = vst [vmem:[#allocation2] sm:$0xff] %v106_v0  ;;  %v265_v3 = vld [vmem:[%s93_s23 + $0x40] sm:$0x1] }
  0x12   : > { %109 = vst [vmem:[#allocation2 + $0x10] sm:$0xff] %v108_v1 }
  0x13   : > { %121 = vst [vmem:[#allocation2 + $0x8] sm:$0x1] %v264_v2 }
  0x14   : > { %123 = vst [vmem:[#allocation2 + $0x18] sm:$0x1] %v265_v3 }
  0x15   : > { %127 = vsyncadd [#allocation3], 288 }
  0x16   : > { %309 = dma.done.wait [#allocation3], 288 }
  0x17   : > { %310 = vsyncadd [#allocation3], 4294967008  ;;  %v132_v8 = vld [vmem:[%s398_s1] sm:$0x3]  ;;  %s272_s27 = sshll.u32 (%p360_p4), %s349_s12, 4 }
  0x18   : > { %v133_v5 = vld [vmem:[#allocation2] sm:$0xff]  ;;  %v164_v9 = vrot.slane %v132_v8, 1  ;;  %v154_v14 = vperm.slane %v132_v8, 0  ;;  %s180_s30 = scalar_lea.vmem (%p360_p4), %s399_s2, %s272_s27 }
  0x19   : > { %135 = vadd.xlane.f32.xlu0 %v133_v5  ;;  %v134_v7 = vld [vmem:[#allocation2 + $0x10] sm:$0xff] }
  0x1a   : > { %v141_v4 = vld [vmem:[#allocation2 + $0x1] sm:$0xff]  ;;  %v165_v15 = vperm.slane %v164_v9, 0 }
  0x1b   : > { %143 = vadd.xlane.f32.xlu1 %v141_v4  ;;  %v142_v6 = vld [vmem:[#allocation2 + $0x11] sm:$0xff] }
  0x21   : > { %137 = vadd.xlane.f32.xlu0 %v134_v7 }
  0x23   : > { %145 = vadd.xlane.f32.xlu1 %v142_v6 }
  0x8c   : > { %v136_v11 = vpop.xlane.xlu0 %135 }
  0x8e   : > { %v144_v10 = vpop.xlane.xlu1 %143 }
  0x8f   : > { %v147_v12 = vadd.f32 %v144_v10, %v136_v11 }
  0x91   : > { %v149_v13 = vmul.f32 0.00390625, %v147_v12 }
  0x93   : > { %v151_v16 = vsub.f32 %v133_v5, %v149_v13  ;;  %v162_v17 = vsub.f32 %v141_v4, %v149_v13 }
  0x94   : > { %v138_v21 = vpop.xlane.xlu0 %137 }
  0x95   : > { %v156_v18 = vmul.f32 %v154_v14, %v151_v16  ;;  %v167_v19 = vmul.f32 %v165_v15, %v162_v17 }
  0x96   : > { %v146_v20 = vpop.xlane.xlu1 %145 }
  0x97   : > { %158 = vst [vmem:[%s368_s24] sm:$0xff] %v156_v18  ;;  %v148_v22 = vadd.f32 %v146_v20, %v138_v21 }
  0x98   : > { %169 = vst [vmem:[%s368_s24 + $0x8] sm:$0xff] %v167_v19 }
  0x99   : > { %v150_v23 = vmul.f32 0.00390625, %v148_v22 }
  0x9b   : > { %v152_v24 = vsub.f32 %v134_v7, %v150_v23  ;;  %v163_v25 = vsub.f32 %v142_v6, %v150_v23 }
  0x9c   : > { %177 = sbr.rel (!%p360_p4) target bundleno = 169 (0xa9), region = 50 }
  0x9d   : > { %v157_v26 = vmul.f32 %v154_v14, %v152_v24  ;;  %v168_v27 = vmul.f32 %v165_v15, %v163_v25 }
  0x9e   : > { %v193_v28 = vld [vmem:[%s368_s24] sm:$0xff] (%p360_p4) }
  0x9f   : > { %159 = vst [vmem:[%s368_s24 + $0x10] sm:$0xff] %v157_v26  ;;  %v195_v29 = vld [vmem:[%s368_s24 + $0x8] sm:$0xff] (%p360_p4) }
  0xa0   : > { %170 = vst [vmem:[%s368_s24 + $0x18] sm:$0xff] %v168_v27 }
  0xa1   : > { %194 = vst [vmem:[%s180_s30] sm:$0xff] %v193_v28 }
  0xa2   : > { %196 = vst [vmem:[%s180_s30 + $0x8] sm:$0xff] %v195_v29 }
  0xa6   : > { %v197_v30 = vld [vmem:[%s368_s24 + $0x10] sm:$0xff] }
  0xa7   : > { %v199_v31 = vld [vmem:[%s368_s24 + $0x18] sm:$0xff]  ;;  %198 = vst [vmem:[%s180_s30 + $0x60] sm:$0xff] %v197_v30 }
  0xa8   : > { %200 = vst [vmem:[%s180_s30 + $0x68] sm:$0xff] %v199_v31 }
  0xa9 PF: > { %p9_p7 = scmp.ge.s32.totalorder %s351_s13, 8   ;;  %s401_s9 = smov %s317_s10 }
  0xaa   : > { %s402_s10 = smov %s358_s16  ;;  %s403_s11 = smov %s351_s13 }
  0xab   :  { %11 = sbr.rel (!%p9_p7) target bundleno = 2 (0x2), region = 107 }
  0xb0   :  { %216 = vsyncmov [#allocation3] }
  0xb3   :  { %s217_s3 = vpop.sfrf %216 }
  0xb4   :  { %p271_p8 = scmp.ne.s32.totalorder %s217_s3, 0 }
  0xb6   :  { %221 = shalt.err (%p271_p8)  }

</bundles_post_ra>
